<compile_context>
chip_gen: v7x
topology: tpu7x:2x2x1
jax: 0.10.0
libtpu: 0.0.40
codegen_flags: <defaults>
</compile_context>

<pallas_src>
import math

import jax
import jax.numpy as jnp
from jax import lax
from jax.experimental import pallas as pl
from jax.experimental.pallas import tpu as pltpu


# ---------------- tile constants (hardware alignment) ----------------
_LANE = 128      # lane multiple (minor dim)
_SUB_BF16 = 16   # bf16 sublane packing: 16 rows per vreg
_TB_MAX = 128    # batch-tile cap (raise to 256 on v6e/v7x if the real batch allows)
_TK_MAX = 2048   # K (=C*H*W) tile cap: each w_img DMA >= ~3 MiB at real CLIP D=768


def _round_up(x, m):
    return (x + m - 1) // m * m


def _pad_feature_dim(d):
    # v6e/v7x MXUs are 2x256x256: prefer a 256-aligned feature dim when the model
    # dim allows (real CLIP D=512/768 already is); tiny synthetic dims pad to 128.
    return _round_up(d, 256) if d >= 256 else _round_up(d, _LANE)


def _choose_tiles(b, p):
    """Batch tile and K tile, adapted down for tiny shapes."""
    tb = min(_TB_MAX, _round_up(max(b, 1), _SUB_BF16))
    tk = min(_TK_MAX, _round_up(p, _LANE))
    return tb, tk


# ---------------- text branch: runs ONCE per class set (adaptation time) ----
def _text_features_kernel(scale_ref, t_ref, w_txt_ref, feat_ref):
    """exp(logit_scale)-scaled, L2-normalized class ("text") features.

    scale_ref: (1, 1)          f32  SMEM  exp(logit_scale)
    t_ref    : (N_pad, E_pad)  f32  VMEM  pooled text-token embeddings (padded rows = 0)
    w_txt_ref: (E_pad, D_pad)  f32  VMEM  synthetic text-encoder projection
    feat_ref : (N_pad, D_pad)  bf16 VMEM  scaled + normalized class features
    """
    txt = jnp.dot(t_ref[...], w_txt_ref[...], preferred_element_type=jnp.float32)
    inv_norm = lax.rsqrt(jnp.sum(txt * txt, axis=-1, keepdims=True) + 1e-12)
    # Fold exp(logit_scale) into the f32 class features (before the bf16 cast) so the
    # per-image hot path is scale-free and bf16 image features stay unit-norm.
    feat_ref[...] = (txt * (inv_norm * scale_ref[0, 0])).astype(feat_ref.dtype)


def encode_text_features(txt_emb, w_txt, logit_scale, d_pad, n_pad):
    """Precompute scaled+normalized class features; returns (D_pad, N_pad) bf16 (K-major)."""
    n, e = txt_emb.shape
    _, d = w_txt.shape
    e_pad = _round_up(e, _LANE)
    t = jnp.pad(txt_emb.astype(jnp.float32), ((0, n_pad - n), (0, e_pad - e)))
    w = jnp.pad(w_txt.astype(jnp.float32), ((0, e_pad - e), (0, d_pad - d)))
    scale = jnp.exp(jnp.asarray(logit_scale, jnp.float32)).reshape(1, 1)
    feat = pl.pallas_call(
        _text_features_kernel,
        out_shape=jax.ShapeDtypeStruct((n_pad, d_pad), jnp.bfloat16),
        in_specs=[pl.BlockSpec(memory_space=pltpu.MemorySpace.SMEM),
                  pl.BlockSpec(memory_space=pltpu.MemorySpace.VMEM),
                  pl.BlockSpec(memory_space=pltpu.MemorySpace.VMEM)],
        out_specs=pl.BlockSpec(memory_space=pltpu.MemorySpace.VMEM),
    )(scale, t, w)
    return feat.T  # (D_pad, N_pad): contraction dim major -> no in-kernel transpose


def prepare_image_projection(w_img, d_pad, tk):
    """Pad the image-encoder projection to (P_pad, D_pad) bf16 once (P_pad % tk == 0)."""
    p, d = w_img.shape
    p_pad = _round_up(p, tk)
    return jnp.pad(w_img.astype(jnp.bfloat16), ((0, p_pad - p), (0, d_pad - d)))


# ---------------- per-image-batch kernel (the forward() hot path) ------------
def _clip_image_head_kernel(x_ref, w_ref, txt_t_ref, bias_ref, probs_ref, acc_ref):
    """grid = (B_pad//TB, P_pad//TK); K axis last ("arbitrary").

    x_ref     : (TB, TK)       bf16 VMEM  flattened-image tile
    w_ref     : (TK, D_pad)    bf16 VMEM  image-projection tile
    txt_t_ref : (D_pad, N_pad) bf16 VMEM  scaled+normalized class features (K-major)
    bias_ref  : (1, N_pad)     f32  VMEM  0 for real classes, -1e30 for padding
    probs_ref : (TB, N_pad)    f32  VMEM  softmax probabilities
    acc_ref   : (TB, D_pad)    f32  VMEM  scratch accumulator (image features)
    """
    k = pl.program_id(1)

    @pl.when(k == 0)
    def _():
        acc_ref[...] = jnp.zeros_like(acc_ref)

    # image projection: accumulate x @ w_img over K tiles (bf16 MXU, f32 acc)
    acc_ref[...] += jnp.dot(x_ref[...], w_ref[...],
                            preferred_element_type=jnp.float32)

    @pl.when(k == pl.num_programs(1) - 1)
    def _():
        img = acc_ref[...]                                             # (TB, D_pad) f32
        # L2-normalize image features (exp(logit_scale) already folded into txt_t).
        inv_norm = lax.rsqrt(jnp.sum(img * img, axis=-1, keepdims=True) + 1e-12)
        img_n = (img * inv_norm).astype(jnp.bfloat16)

        # logits_per_image = exp(logit_scale) * img_norm @ txt_norm.T
        logits = jnp.dot(img_n, txt_t_ref[...],
                         preferred_element_type=jnp.float32)           # (TB, N_pad)
        logits = logits + bias_ref[...]                                # mask padded classes

        # softmax(dim=-1); exact reciprocal so every row sums to 1 in f32
        m = jnp.max(logits, axis=-1, keepdims=True)
        e = jnp.exp(logits - m)
        probs_ref[...] = e * pl.reciprocal(
            jnp.sum(e, axis=-1, keepdims=True), approx=False)


def class_incremental_forward(image_nchw, w_img_padded, txt_t, n_classes):
    """probs = softmax(exp(logit_scale) * norm(img_enc(image)) @ norm(txt_enc(text)).T)."""
    b = image_nchw.shape[0]
    # NCHW row-major flatten; cast to bf16 BEFORE padding so the wrapper only
    # touches the activations once at half width.
    x = image_nchw.reshape(b, -1).astype(jnp.bfloat16)
    p = x.shape[1]
    p_pad, d_pad = w_img_padded.shape
    n_pad = txt_t.shape[1]

    tb, tk = _choose_tiles(b, p)
    assert p_pad % tk == 0, "w_img_padded must be prepared with the same K tile"
    b_pad = _round_up(b, tb)

    x = jnp.pad(x, ((0, b_pad - b), (0, p_pad - p)))
    bias = jnp.where(jnp.arange(n_pad) < n_classes, 0.0, -1e30)
    bias = bias.astype(jnp.float32).reshape(1, n_pad)

    grid = (b_pad // tb, p_pad // tk)
    n_batch_tiles = grid[0]

    # VMEM budget: double-buffered x + w + (constant-index) txt_t/bias + output,
    # plus the f32 accumulator.  Set the scoped limit explicitly so the larger
    # tiles never trip v5e(16MiB)/v6e(32MiB)/v7x(32-of-64MiB) defaults, with
    # headroom but capped well below v7x's 64 MiB physical VMEM.
    vmem_need = (2 * tb * tk * 2            # x (bf16, double-buffered)
                 + 2 * tk * d_pad * 2       # w_img (bf16, double-buffered)
                 + 2 * d_pad * n_pad * 2    # txt_t (constant index; buffered but never re-DMA'd)
                 + 2 * n_pad * 4            # bias
                 + 2 * tb * n_pad * 4       # output
                 + tb * d_pad * 4)          # accumulator scratch
    vmem_limit = int(min(48 * 1024 * 1024, max(2 * vmem_need, 16 * 1024 * 1024)))

    cost = pl.CostEstimate(
        flops=2 * b_pad * p_pad * d_pad + 2 * b_pad * d_pad * n_pad,
        transcendentals=b_pad * n_pad + b_pad,
        bytes_accessed=(x.size * 2                                   # image, streamed once
                        + w_img_padded.size * 2 * n_batch_tiles     # weights, once per batch tile
                        + txt_t.size * 2 + bias.size * 4
                        + b_pad * n_pad * 4),
    )

    probs = pl.pallas_call(
        _clip_image_head_kernel,
        out_shape=jax.ShapeDtypeStruct((b_pad, n_pad), jnp.float32),
        grid_spec=pltpu.PrefetchScalarGridSpec(
            num_scalar_prefetch=0,
            grid=grid,
            in_specs=[
                pl.BlockSpec((tb, tk), lambda i, k: (i, k)),         # image tile
                pl.BlockSpec((tk, d_pad), lambda i, k: (k, 0)),      # w_img tile
                # constant-index blocks: fetched once, stay resident across the grid
                pl.BlockSpec((d_pad, n_pad), lambda i, k: (0, 0)),   # class features (K-major)
                pl.BlockSpec((1, n_pad), lambda i, k: (0, 0)),       # class-mask bias
            ],
            out_specs=pl.BlockSpec((tb, n_pad), lambda i, k: (i, 0)),
            scratch_shapes=[pltpu.VMEM((tb, d_pad), jnp.float32)],
        ),
        compiler_params=pltpu.CompilerParams(
            dimension_semantics=("parallel", "arbitrary"),
            vmem_limit_bytes=vmem_limit),
        cost_estimate=cost,
    )(x, w_img_padded, txt_t, bias)

    return probs[:b, :n_classes]


if __name__ == "__main__":
    # Small shapes consistent with the module's forward: image batch + text tokens per class.
    B, C, H, W = 2, 4, 16, 16          # image: NCHW
    N_CLASSES = 8                      # len(current_class_names)
    SEQ = 8                            # tokenized prompt length
    VOCAB = 64                         # synthetic token vocab
    E = 32                             # text embedding width
    D = 32                             # shared CLIP feature dim

    key = jax.random.PRNGKey(0)
    k_img, k_wimg, k_tok, k_emb, k_wtxt = jax.random.split(key, 5)

    # forward() inputs: image tensor + self.text_tokens (int token ids per class)
    image = jax.random.normal(k_img, (B, C, H, W), dtype=jnp.float32)
    text_tokens = jax.random.randint(k_tok, (N_CLASSES, SEQ), 0, VOCAB)

    # Deterministic synthetic "encoder" parameters (stand-in for CLIP weights).
    # TODO(synk): real CLIP ViT / text transformer not reproduced; synthetic linear encoders used.
    w_img = jax.random.normal(k_wimg, (C * H * W, D), dtype=jnp.float32) * 0.02
    embed_table = jax.random.normal(k_emb, (VOCAB, E), dtype=jnp.float32) * 0.02
    w_txt = jax.random.normal(k_wtxt, (E, D), dtype=jnp.float32) * 0.02
    logit_scale = math.log(1.0 / 0.07)  # CLIP init for logit_scale

    # adaptation()-time glue: token-embedding lookup + mean-pool (plain JAX, once per class set)
    txt_emb = jnp.mean(embed_table[text_tokens], axis=1)               # (N_CLASSES, E)

    d_pad = _pad_feature_dim(D)
    n_pad = _round_up(N_CLASSES, _LANE)
    _, tk = _choose_tiles(B, C * H * W)

    # Hoisted once-per-class-set / once-per-model precompute (not in the per-image hot path):
    txt_t = encode_text_features(txt_emb, w_txt, logit_scale, d_pad, n_pad)  # (D_pad, N_pad) bf16
    w_img_p = prepare_image_projection(w_img, d_pad, tk)                     # (P_pad, D_pad) bf16

    probs = class_incremental_forward(image, w_img_p, txt_t, N_CLASSES)
    probs = jax.block_until_ready(probs)

    # Sanity checks.
    assert probs.shape == (B, N_CLASSES)
    assert bool(jnp.all(jnp.isfinite(probs)))
    assert jnp.allclose(jnp.sum(probs, axis=-1), 1.0, atol=1e-4)

    # Cross-check against a pure-JAX f32 reference (bf16 matmul tolerance).
    img_ref = image.reshape(B, -1) @ w_img
    img_ref = img_ref / jnp.linalg.norm(img_ref, axis=-1, keepdims=True)
    txt_ref = txt_emb @ w_txt
    txt_ref = txt_ref / jnp.linalg.norm(txt_ref, axis=-1, keepdims=True)
    ref = jax.nn.softmax(math.exp(logit_scale) * img_ref @ txt_ref.T, axis=-1)
    assert jnp.allclose(probs, ref, atol=5e-2)

    print("KERNEL_OK")
</pallas_src>

<mosaic_0001>
module attributes {stable_mosaic.version = 11 : i64} {
  func.func @_text_features_kernel(%arg0: memref<1x1xf32, #tpu.memory_space<smem>>, %arg1: memref<128x128xf32, #tpu.memory_space<vmem>>, %arg2: memref<128x128xf32, #tpu.memory_space<vmem>>, %arg3: memref<128x128xbf16, #tpu.memory_space<vmem>>) attributes {dimension_semantics = [], scalar_prefetch = 0 : i64, scratch_operands = 0 : i64, tpu.core_type = #tpu.core_type<tc>} {
    %c0 = arith.constant 0 : index
    %c0_0 = arith.constant 0 : index
    %0 = vector.load %arg1[%c0, %c0_0] : memref<128x128xf32, #tpu.memory_space<vmem>>, vector<128x128xf32>
    %c0_1 = arith.constant 0 : index
    %c0_2 = arith.constant 0 : index
    %1 = vector.load %arg2[%c0_1, %c0_2] : memref<128x128xf32, #tpu.memory_space<vmem>>, vector<128x128xf32>
    %cst = arith.constant dense<0.000000e+00> : vector<128x128xf32>
    %2 = tpu.matmul %0, %1, %cst {dimension_numbers = #tpu.dot_dimension_numbers<[1], [0], [0], [1], [0, 0, 1, 1], [], []>} : vector<128x128xf32>, vector<128x128xf32>, vector<128x128xf32> -> vector<128x128xf32>
    %3 = arith.mulf %2, %2 : vector<128x128xf32>
    %cst_3 = arith.constant dense<0.000000e+00> : vector<128xf32>
    %4 = vector.multi_reduction <add>, %3, %cst_3 [1] : vector<128x128xf32> to vector<128xf32>
    %5 = vector.shape_cast %4 : vector<128xf32> to vector<128x1xf32>
    %cst_4 = arith.constant 9.99999996E-13 : f32
    %6 = vector.broadcast %cst_4 : f32 to vector<128x1xf32>
    %7 = arith.addf %5, %6 : vector<128x1xf32>
    %8 = math.rsqrt %7 : vector<128x1xf32>
    %c0_5 = arith.constant 0 : index
    %c0_6 = arith.constant 0 : index
    %9 = memref.load %arg0[%c0_5, %c0_6] : memref<1x1xf32, #tpu.memory_space<smem>>
    %10 = vector.broadcast %9 : f32 to vector<128x1xf32>
    %11 = arith.mulf %8, %10 : vector<128x1xf32>
    %12 = vector.broadcast %11 : vector<128x1xf32> to vector<128x128xf32>
    %13 = arith.mulf %2, %12 : vector<128x128xf32>
    %14 = arith.truncf %13 : vector<128x128xf32> to vector<128x128xbf16>
    %c0_7 = arith.constant 0 : index
    %c0_8 = arith.constant 0 : index
    %15 = vector.load %arg3[%c0_7, %c0_8] : memref<128x128xbf16, #tpu.memory_space<vmem>>, vector<128x128xbf16>
    tpu.vector_store %arg3[%c0_7, %c0_8], %14 {strides = array<i32>} : memref<128x128xbf16, #tpu.memory_space<vmem>>, vector<128x128xbf16>,
    return
  }
}

</mosaic_0001>

<bundles_post_ra>
// kernel: tpu_custom_call.1
= control target key start
LH: loop header
LB: loop body
LE: loop exit
PB: predicated region body
PF: predicated region fallthrough
CT: control target
= control target key end

     0   :  { %9 = vsyncpa [#allocation4], 0  ;;  %s923_s0 = inlined_call_operand.<no memory space> [shape: f32[1,1], index: 0, kind: input, shape index: {}]   ;;  %s924_s1 = inlined_call_operand.hbm [shape: f32[128,128], index: 1, kind: input, shape index: {}]   ;;  %s925_s2 = inlined_call_operand.hbm [shape: f32[128,128], index: 2, kind: input, shape index: {}]   ;;  %s926_s3 = inlined_call_operand.hbm [shape: bf16[128,128], index: 3, kind: output, shape index: {}]  }
   0x1   :  { %10 = vsyncpa [#allocation7], 0 }
   0x2   :  { %11 = vsyncpa [#allocation5], 0  ;;  %s759_s12 = smov [#allocation3]   ;;  %s687_s16 = scalar_lea.hbm %s924_s1, 2048 }
   0x3   :  { %s19_s13 = sshll.u32 %s759_s12, 4  ;;  %p688_p0 = scmp.ne.s32.totalorder %s924_s1, %s687_s16  ;;  %s20_s13 = int_to_ptr.vmem [resolvable:$true] %s19_s13 }
   0x4   :  { %p691_p1 = scmp.lt.u32.totalorder %s687_s16, %s924_s1 }
   0x6   :  { %p693_p2 = pnand %p691_p1, %p688_p0 }
   0x8   :  { %696 = shalt.err (!%p693_p2)
}
   0x9   :  { %s697_s21 = scalar_lea.vmem %s20_s13, 2048  ;;  %p702_p4 = scmp.lt.s32.totalorder %s20_s13, %s20_s13 }
   0xa   :  { %p698_p3 = scmp.ne.s32.totalorder %s20_s13, %s697_s21  ;;  %p703_p5 = scmp.lt.s32.totalorder %s697_s21, %s697_s21 }
   0xc   :  { %p704_p6 = por %p703_p5, %p702_p4 }
   0xe   :  { %p705_p7 = pnand %p704_p6, %p698_p3 }
  0x10   :  { %708 = shalt.err (!%p705_p7)
}
  0x11   :  { %s760_s22 = smov 128   ;;  %s761_s23 = smov 8  }
  0x12   :  { %25 = dma.hbm_to_vmem [thread:$0]  %s924_s1, 2048, %s20_s13, [#allocation4], %s760_s22, %s760_s22, %s761_s23  }
  0x13   :  { %s762_s26 = smov [#allocation6]   ;;  %s709_s30 = scalar_lea.hbm %s925_s2, 2048 }
  0x14   :  { %s31_s27 = sshll.u32 %s762_s26, 4  ;;  %p710_p8 = scmp.ne.s32.totalorder %s925_s2, %s709_s30  ;;  %s32_s27 = int_to_ptr.vmem [resolvable:$true] %s31_s27 }
  0x15   :  { %p713_p9 = scmp.lt.u32.totalorder %s709_s30, %s925_s2 }
  0x17   :  { %p715_p10 = pnand %p713_p9, %p710_p8 }
  0x19   :  { %718 = shalt.err (!%p715_p10)
}
  0x1a   :  { %s719_s8 = scalar_lea.vmem %s32_s27, 2048  ;;  %p724_p12 = scmp.lt.s32.totalorder %s32_s27, %s32_s27 }
  0x1b   :  { %p720_p11 = scmp.ne.s32.totalorder %s32_s27, %s719_s8  ;;  %p725_p13 = scmp.lt.s32.totalorder %s719_s8, %s719_s8 }
  0x1d   :  { %p726_p0 = por %p725_p13, %p724_p12 }
  0x1f   :  { %p727_p1 = pnand %p726_p0, %p720_p11 }
  0x21   :  { %730 = shalt.err (!%p727_p1)
}
  0x22   :  { %37 = dma.hbm_to_vmem [thread:$0]  %s925_s2, 2048, %s32_s27, [#allocation7], %s760_s22, %s760_s22, %s761_s23  }
  0x23   :  { %753 = dma.done.wait [#allocation4], 2048  }
  0x24   :  { %754 = vsyncadd [#allocation4], 4294965248 }
  0x25   :  { %755 = dma.done.wait [#allocation7], 2048  }
  0x26   :  { %756 = vsyncadd [#allocation7], 4294965248  ;;  %v60_v0 = vld [vmem:[#allocation6] sm:$0xff]  ;;  %v61_v1 = vld [vmem:[#allocation6 + $0x8] sm:$0xff] }
  0x27   :  { %v62_v2 = vld [vmem:[#allocation6 + $0x10] sm:$0xff]  ;;  %v600_v3 = vpack.c.bf16 %v61_v1, %v60_v0  ;;  %v63_v4 = vld [vmem:[#allocation6 + $0x18] sm:$0xff]  ;;  %v64_v6 = vld [vmem:[#allocation6 + $0x20] sm:$0xff] }
  0x28   :  { %v604_v5 = vpack.c.bf16 %v63_v4, %v62_v2  ;;  %v65_v7 = vld [vmem:[#allocation6 + $0x28] sm:$0xff]  ;;  %v44_v9 = vld [vmem:[#allocation3] sm:$0xff]  ;;  %v66_v11 = vld [vmem:[#allocation6 + $0x30] sm:$0xff] }
  0x29   :  { %601 = vmatprep.subr.bf16.mxu0 %v600_v3  ;;  %632 = vmatprep.subr.bf16.mxu1 %v600_v3  ;;  %v608_v8 = vpack.c.bf16 %v65_v7, %v64_v6  ;;  %v52_v10 = vld [vmem:[#allocation3 + $0x40] sm:$0xff]  ;;  %v67_v12 = vld [vmem:[#allocation6 + $0x38] sm:$0xff]  ;;  %v69_v15 = vld [vmem:[#allocation6 + $0x48] sm:$0xff] }
  0x2a   :  { %603 = vmatpush3.bf16.msra.mxu0 %v600_v3  ;;  %640 = vmatpush3.bf16.msra.mxu1 %v600_v3  ;;  %v612_v13 = vpack.c.bf16 %v67_v12, %v66_v11  ;;  %v68_v14 = vld [vmem:[#allocation6 + $0x40] sm:$0xff]  ;;  %v70_v17 = vld [vmem:[#allocation6 + $0x50] sm:$0xff]  ;;  %v71_v18 = vld [vmem:[#allocation6 + $0x58] sm:$0xff] }
  0x2b   :  { %605 = vmatprep.subr.bf16.mxu0 %v604_v5  ;;  %633 = vmatprep.subr.bf16.mxu1 %v604_v5  ;;  %v616_v16 = vpack.c.bf16 %v69_v15, %v68_v14  ;;  %v620_v19 = vpack.c.bf16 %v71_v18, %v70_v17  ;;  %v72_v20 = vld [vmem:[#allocation6 + $0x60] sm:$0xff]  ;;  %v73_v21 = vld [vmem:[#allocation6 + $0x68] sm:$0xff]  ;;  %v74_v23 = vld [vmem:[#allocation6 + $0x70] sm:$0xff] }
  0x2c   :  { %576 = vmatprep.mubr.f32.mxu0 %v44_v9  ;;  %588 = vmatprep.mubr.f32.mxu1 %v52_v10  ;;  %v624_v22 = vpack.c.bf16 %v73_v21, %v72_v20  ;;  %v75_v24 = vld [vmem:[#allocation6 + $0x78] sm:$0xff]  ;;  %v45_v26 = vld [vmem:[#allocation3 + $0x8] sm:$0xff]  ;;  %v46_v28 = vld [vmem:[#allocation3 + $0x10] sm:$0xff] }
  0x2d   :  { %v628_v25 = vpack.c.bf16 %v75_v24, %v74_v23  ;;  %v53_v27 = vld [vmem:[#allocation3 + $0x48] sm:$0xff]  ;;  %v54_v29 = vld [vmem:[#allocation3 + $0x50] sm:$0xff]  ;;  %v47_v30 = vld [vmem:[#allocation3 + $0x18] sm:$0xff] }
  0x2e   :  { %607 = vmatpush3.bf16.msra.mxu0 %v604_v5  ;;  %641 = vmatpush3.bf16.msra.mxu1 %v604_v5  ;;  %v55_v31 = vld [vmem:[#allocation3 + $0x58] sm:$0xff]  ;;  %v48_v32 = vld [vmem:[#allocation3 + $0x20] sm:$0xff]  ;;  %v49_v34 = vld [vmem:[#allocation3 + $0x28] sm:$0xff] }
  0x2f   :  { %609 = vmatprep.subr.bf16.mxu0 %v608_v8  ;;  %634 = vmatprep.subr.bf16.mxu1 %v608_v8  ;;  %v56_v33 = vld [vmem:[#allocation3 + $0x60] sm:$0xff]  ;;  %v57_v35 = vld [vmem:[#allocation3 + $0x68] sm:$0xff]  ;;  %v50_v36 = vld [vmem:[#allocation3 + $0x30] sm:$0xff] }
  0x30   :  { %v58_v37 = vld [vmem:[#allocation3 + $0x70] sm:$0xff]  ;;  %v51_v38 = vld [vmem:[#allocation3 + $0x38] sm:$0xff] }
  0x31   :  { %v59_v39 = vld [vmem:[#allocation3 + $0x78] sm:$0xff] }
  0x32   :  { %611 = vmatpush3.bf16.msra.mxu0 %v608_v8  ;;  %642 = vmatpush3.bf16.msra.mxu1 %v608_v8 }
  0x33   :  { %613 = vmatprep.subr.bf16.mxu0 %v612_v13  ;;  %635 = vmatprep.subr.bf16.mxu1 %v612_v13 }
  0x36   :  { %615 = vmatpush3.bf16.msra.mxu0 %v612_v13  ;;  %643 = vmatpush3.bf16.msra.mxu1 %v612_v13 }
  0x37   :  { %617 = vmatprep.subr.bf16.mxu0 %v616_v16  ;;  %636 = vmatprep.subr.bf16.mxu1 %v616_v16 }
  0x3a   :  { %619 = vmatpush3.bf16.msra.mxu0 %v616_v16  ;;  %644 = vmatpush3.bf16.msra.mxu1 %v616_v16 }
  0x3b   :  { %621 = vmatprep.subr.bf16.mxu0 %v620_v19  ;;  %637 = vmatprep.subr.bf16.mxu1 %v620_v19 }
  0x3e   :  { %623 = vmatpush3.bf16.msra.mxu0 %v620_v19  ;;  %645 = vmatpush3.bf16.msra.mxu1 %v620_v19 }
  0x3f   :  { %625 = vmatprep.subr.bf16.mxu0 %v624_v22  ;;  %638 = vmatprep.subr.bf16.mxu1 %v624_v22 }
  0x42   :  { %627 = vmatpush3.bf16.msra.mxu0 %v624_v22  ;;  %646 = vmatpush3.bf16.msra.mxu1 %v624_v22  ;;  %v877_v22 = vstv %s923_s0  ;;  %s763_s0 = smov [#allocation8]  }
  0x43   :  { %629 = vmatprep.subr.bf16.mxu0 %v628_v25  ;;  %639 = vmatprep.subr.bf16.mxu1 %v628_v25  ;;  %s420_s11 = sshll.u32 %s763_s0, 4  ;;  %s421_s11 = int_to_ptr.vmem [resolvable:$true] %s420_s11 }
  0x44   :  { %s731_s12 = scalar_lea.vmem %s421_s11, 1024  ;;  %p736_p3 = scmp.lt.s32.totalorder %s421_s11, %s421_s11 }
  0x45   :  { %p732_p2 = scmp.ne.s32.totalorder %s421_s11, %s731_s12  ;;  %p737_p4 = scmp.lt.s32.totalorder %s731_s12, %s731_s12 }
  0x46   :  { %631 = vmatpush3.bf16.msra.mxu0 %v628_v25  ;;  %647 = vmatpush3.bf16.msra.mxu1 %v628_v25 }
  0x47   :  { %p738_p5 = por %p737_p4, %p736_p3 }
  0x49   :  { %577 = vmatmul.mubr.f32.vlgmr.msra.gmra.mrb[0].mxu0 %v45_v26  ;;  %589 = vmatmul.mubr.f32.vlgmr.msra.gmra.mrb[0].mxu1 %v53_v27  ;;  %p739_p6 = pnand %p738_p5, %p732_p2 }
  0x4a   :  { %579 = vmatprep.mubr.f32.mxu0 %v46_v28  ;;  %591 = vmatprep.mubr.f32.mxu1 %v54_v29 }
  0x4d   :  { %580 = vmatmul.mubr.f32.gmra.mrb[2].mxu0 %v47_v30  ;;  %592 = vmatmul.mubr.f32.gmra.mrb[2].mxu1 %v55_v31 }
  0x4e   :  { %582 = vmatprep.mubr.f32.mxu0 %v48_v32  ;;  %594 = vmatprep.mubr.f32.mxu1 %v56_v33 }
  0x51   :  { %583 = vmatmul.mubr.f32.gmra.mrb[4].mxu0 %v49_v34  ;;  %595 = vmatmul.mubr.f32.gmra.mrb[4].mxu1 %v57_v35 }
  0x52   :  { %585 = vmatprep.mubr.f32.mxu0 %v50_v36  ;;  %597 = vmatprep.mubr.f32.mxu1 %v58_v37 }
  0x55   :  { %586 = vmatmul.mubr.f32.gmra.mrb[6].mxu0 %v51_v38  ;;  %598 = vmatmul.mubr.f32.gmra.mrb[6].mxu1 %v59_v39 }
 0x11c   :  { %v810_v40 = vpop.f32.mrb[0].mxu0  ;;  %v812_v41 = vpop.f32.mrb[0].mxu1 }
 0x11d   :  { %v814_v42 = vpop.f32.mrb[1].mxu0  ;;  %v816_v43 = vpop.f32.mrb[1].mxu1  ;;  %v230_v44 = vmul.f32 %v812_v41, %v812_v41  ;;  %v222_v45 = vmul.f32 %v810_v40, %v810_v40 }
 0x11e   :  { %v221_v49 = vmul.f32 %v814_v42, %v814_v42  ;;  %v229_v55 = vmul.f32 %v816_v43, %v816_v43 }
 0x11f   :  { %255 = vadd.xlane.f32.xlu1 %v230_v44  ;;  %239 = vadd.xlane.f32.xlu0 %v222_v45 }
 0x120   :  { %v822_v46 = vpop.f32.mrb[2].mxu0  ;;  %v824_v47 = vpop.f32.mrb[2].mxu1 }
 0x121   :  { %v826_v48 = vpop.f32.mrb[3].mxu0  ;;  %v224_v50 = vmul.f32 %v822_v46, %v822_v46  ;;  %v832_v51 = vpop.f32.mrb[3].mxu1  ;;  %v232_v52 = vmul.f32 %v824_v47, %v824_v47 }
 0x122   :  { %v231_v60 = vmul.f32 %v832_v51, %v832_v51  ;;  %v223_v61 = vmul.f32 %v826_v48, %v826_v48 }
 0x123   :  { %237 = vadd.xlane.f32.xlu0 %v221_v49  ;;  %243 = vadd.xlane.f32.xlu1 %v224_v50 }
 0x124   :  { %v836_v53 = vpop.f32.mrb[4].mxu0  ;;  %v838_v54 = vpop.f32.mrb[4].mxu1 }
 0x125   :  { %v842_v56 = vpop.f32.mrb[5].mxu0  ;;  %v844_v57 = vpop.f32.mrb[5].mxu1  ;;  %v226_v0 = vmul.f32 %v836_v53, %v836_v53  ;;  %v234_v2 = vmul.f32 %v838_v54, %v838_v54 }
 0x126   :  { %v225_v1 = vmul.f32 %v842_v56, %v842_v56  ;;  %v233_v3 = vmul.f32 %v844_v57, %v844_v57 }
 0x127   :  { %253 = vadd.xlane.f32.xlu0 %v229_v55  ;;  %259 = vadd.xlane.f32.xlu1 %v232_v52 }
 0x128   :  { %v846_v58 = vpop.f32.mrb[6].mxu0  ;;  %v848_v59 = vpop.f32.mrb[6].mxu1 }
 0x129   :  { %v854_v62 = vpop.f32.mrb[7].mxu0  ;;  %v856_v63 = vpop.f32.mrb[7].mxu1  ;;  %v228_v5 = vmul.f32 %v846_v58, %v846_v58  ;;  %v236_v7 = vmul.f32 %v848_v59, %v848_v59 }
 0x12a   :  { %v227_v4 = vmul.f32 %v854_v62, %v854_v62  ;;  %v235_v6 = vmul.f32 %v856_v63, %v856_v63 }
 0x12b   :  { %257 = vadd.xlane.f32.xlu0 %v231_v60  ;;  %241 = vadd.xlane.f32.xlu1 %v223_v61 }
 0x12f   :  { %247 = vadd.xlane.f32.xlu1 %v226_v0  ;;  %245 = vadd.xlane.f32.xlu0 %v225_v1 }
 0x133   :  { %263 = vadd.xlane.f32.xlu1 %v234_v2  ;;  %261 = vadd.xlane.f32.xlu0 %v233_v3 }
 0x137   :  { %251 = vadd.xlane.f32.xlu1 %v228_v5  ;;  %249 = vadd.xlane.f32.xlu0 %v227_v4 }
 0x13b   :  { %267 = vadd.xlane.f32.xlu1 %v236_v7  ;;  %265 = vadd.xlane.f32.xlu0 %v235_v6 }
 0x1ac   :  { %v256_v8 = vpop.xlane.xlu1 %255  ;;  %v240_v9 = vpop.xlane.xlu0 %239 }
 0x1ad   :  { %v270_v10 = vadd.f32 1e-12, %v240_v9  ;;  %v278_v11 = vadd.f32 1e-12, %v256_v8 }
 0x1af   :  { %655 = vrsqrt.f32 %v270_v10 }
 0x1b0   :  { %v238_v12 = vpop.xlane.xlu0 %237  ;;  %v244_v13 = vpop.xlane.xlu1 %243  ;;  %657 = vrsqrt.f32 %v278_v11 }
 0x1b1   :  { %v269_v14 = vadd.f32 1e-12, %v238_v12  ;;  %v272_v15 = vadd.f32 1e-12, %v244_v13 }
 0x1b3   :  { %659 = vrsqrt.f32 %v269_v14 }
 0x1b4   :  { %v254_v16 = vpop.xlane.xlu0 %253  ;;  %v260_v17 = vpop.xlane.xlu1 %259  ;;  %661 = vrsqrt.f32 %v272_v15 }
 0x1b5   :  { %v277_v18 = vadd.f32 1e-12, %v254_v16  ;;  %v280_v19 = vadd.f32 1e-12, %v260_v17 }
 0x1b7   :  { %663 = vrsqrt.f32 %v277_v18 }
 0x1b8   :  { %665 = vrsqrt.f32 %v280_v19  ;;  %v258_v20 = vpop.xlane.xlu0 %257  ;;  %v242_v21 = vpop.xlane.xlu1 %241 }
 0x1b9   :  { %v279_v23 = vadd.f32 1e-12, %v258_v20  ;;  %v271_v24 = vadd.f32 1e-12, %v242_v21  ;;  %v656_v25 = vpop.eup %655 }
 0x1ba   :  { %v658_v26 = vpop.eup %657  ;;  %v304_v27 = vmul.f32 %v656_v25, %v877_v22 }
 0x1bb   :  { %667 = vrsqrt.f32 %v279_v23  ;;  %v312_v35 = vmul.f32 %v658_v26, %v877_v22 }
 0x1bc   :  { %669 = vrsqrt.f32 %v271_v24  ;;  %v248_v28 = vpop.xlane.xlu1 %247  ;;  %v246_v29 = vpop.xlane.xlu0 %245  ;;  %v320_v36 = vmul.f32 %v810_v40, %v304_v27 }
 0x1bd   :  { %v660_v30 = vpop.eup %659  ;;  %v274_v31 = vadd.f32 1e-12, %v248_v28  ;;  %v273_v32 = vadd.f32 1e-12, %v246_v29  ;;  %v328_v60 = vmul.f32 %v812_v41, %v312_v35 }
 0x1be   :  { %v303_v33 = vmul.f32 %v660_v30, %v877_v22  ;;  %v662_v34 = vpop.eup %661 }
 0x1bf   :  { %671 = vrsqrt.f32 %v274_v31  ;;  %v306_v2 = vmul.f32 %v662_v34, %v877_v22 }
 0x1c0   :  { %v319_v37 = vmul.f32 %v303_v33, %v814_v42  ;;  %673 = vrsqrt.f32 %v273_v32  ;;  %v264_v38 = vpop.xlane.xlu1 %263  ;;  %v262_v39 = vpop.xlane.xlu0 %261 }
 0x1c1   :  { %v664_v44 = vpop.eup %663  ;;  %v282_v45 = vadd.f32 1e-12, %v264_v38  ;;  %v281_v49 = vadd.f32 1e-12, %v262_v39  ;;  %v322_v12 = vmul.f32 %v822_v46, %v306_v2 }
 0x1c2   :  { %v666_v50 = vpop.eup %665  ;;  %v468_v52 = vpack.c.bf16 %v320_v36, %v319_v37  ;;  %v311_v55 = vmul.f32 %v664_v44, %v877_v22 }
 0x1c3   :  { %675 = vrsqrt.f32 %v282_v45  ;;  %v314_v40 = vmul.f32 %v666_v50, %v877_v22 }
 0x1c4   :  { %469 = vst [vmem:[#allocation8] sm:$0xff] %v468_v52   ;;  %v327_v61 = vmul.f32 %v311_v55, %v816_v43  ;;  %677 = vrsqrt.f32 %v281_v49  ;;  %v252_v42 = vpop.xlane.xlu1 %251  ;;  %v250_v0 = vpop.xlane.xlu0 %249 }
 0x1c5   :  { %v668_v1 = vpop.eup %667  ;;  %v276_v3 = vadd.f32 1e-12, %v252_v42  ;;  %v275_v4 = vadd.f32 1e-12, %v250_v0  ;;  %v330_v41 = vmul.f32 %v824_v47, %v314_v40 }
 0x1c6   :  { %v670_v5 = vpop.eup %669  ;;  %v488_v6 = vpack.c.bf16 %v328_v60, %v327_v61  ;;  %v313_v7 = vmul.f32 %v668_v1, %v877_v22 }
 0x1c7   :  { %v305_v8 = vmul.f32 %v670_v5, %v877_v22  ;;  %679 = vrsqrt.f32 %v276_v3 }
 0x1c8   :  { %508 = vst [vmem:[#allocation8 + $0x20] sm:$0xff] %v488_v6   ;;  %v329_v43 = vmul.f32 %v313_v7, %v832_v51  ;;  %681 = vrsqrt.f32 %v275_v4  ;;  %v268_v9 = vpop.xlane.xlu1 %267  ;;  %v266_v10 = vpop.xlane.xlu0 %265 }
 0x1c9   :  { %v672_v11 = vpop.eup %671  ;;  %v321_v13 = vmul.f32 %v305_v8, %v826_v48  ;;  %v284_v14 = vadd.f32 1e-12, %v268_v9  ;;  %v283_v15 = vadd.f32 1e-12, %v266_v10 }
 0x1ca   :  { %v674_v16 = vpop.eup %673  ;;  %v493_v17 = vpack.c.bf16 %v330_v41, %v329_v43  ;;  %v308_v18 = vmul.f32 %v672_v11, %v877_v22 }
 0x1cb   :  { %v473_v19 = vpack.c.bf16 %v322_v12, %v321_v13  ;;  %v307_v20 = vmul.f32 %v674_v16, %v877_v22  ;;  %683 = vrsqrt.f32 %v284_v14 }
 0x1cc   :  { %509 = vst [vmem:[#allocation8 + $0x28] sm:$0xff] %v493_v17   ;;  %v324_v47 = vmul.f32 %v836_v53, %v308_v18  ;;  %685 = vrsqrt.f32 %v283_v15 }
 0x1cd   :  { %v676_v51 = vpop.eup %675  ;;  %505 = vst [vmem:[#allocation8 + $0x8] sm:$0xff] %v473_v19   ;;  %v323_v46 = vmul.f32 %v307_v20, %v842_v56 }
 0x1ce   :  { %v678_v21 = vpop.eup %677  ;;  %v316_v48 = vmul.f32 %v676_v51, %v877_v22 }
 0x1cf   :  { %v478_v23 = vpack.c.bf16 %v324_v47, %v323_v46  ;;  %v315_v24 = vmul.f32 %v678_v21, %v877_v22 }
 0x1d0   :  { %v332_v25 = vmul.f32 %v838_v54, %v316_v48 }
 0x1d1   :  { %v680_v26 = vpop.eup %679  ;;  %506 = vst [vmem:[#allocation8 + $0x10] sm:$0xff] %v478_v23   ;;  %v331_v27 = vmul.f32 %v315_v24, %v844_v57 }
 0x1d2   :  { %v682_v28 = vpop.eup %681  ;;  %v310_v53 = vmul.f32 %v680_v26, %v877_v22 }
 0x1d3   :  { %v498_v29 = vpack.c.bf16 %v332_v25, %v331_v27  ;;  %v309_v30 = vmul.f32 %v682_v28, %v877_v22 }
 0x1d4   :  { %v326_v56 = vmul.f32 %v846_v58, %v310_v53 }
 0x1d5   :  { %v684_v31 = vpop.eup %683  ;;  %510 = vst [vmem:[#allocation8 + $0x30] sm:$0xff] %v498_v29   ;;  %v325_v32 = vmul.f32 %v309_v30, %v854_v62 }
 0x1d6   :  { %v686_v33 = vpop.eup %685  ;;  %v318_v34 = vmul.f32 %v684_v31, %v877_v22 }
 0x1d7   :  { %v483_v54 = vpack.c.bf16 %v326_v56, %v325_v32  ;;  %v317_v35 = vmul.f32 %v686_v33, %v877_v22 }
 0x1d8   :  { %v334_v57 = vmul.f32 %v848_v59, %v318_v34 }
 0x1d9   :  { %507 = vst [vmem:[#allocation8 + $0x18] sm:$0xff] %v483_v54   ;;  %v333_v36 = vmul.f32 %v317_v35, %v856_v63 }
 0x1db   :  { %v503_v37 = vpack.c.bf16 %v334_v57, %v333_v36 }
 0x1dd   :  { %511 = vst [vmem:[#allocation8 + $0x38] sm:$0xff] %v503_v37  }
 0x1de   :  { %742 = shalt.err (!%p739_p6)
}
 0x1df   :  { %s743_s15 = scalar_lea.hbm %s926_s3, 1024 }
 0x1e0   :  { %p744_p7 = scmp.ne.s32.totalorder %s926_s3, %s743_s15  ;;  %p747_p8 = scmp.lt.u32.totalorder %s743_s15, %s926_s3 }
 0x1e2   :  { %p749_p9 = pnand %p747_p8, %p744_p7 }
 0x1e4   :  { %752 = shalt.err (!%p749_p9)
}
 0x1e5   :  { %s764_s20 = smov 64   ;;  %s765_s21 = smov 4  }
 0x1e6   :  { %426 = dma.vmem_to_hbm [thread:$0]  %s421_s11, 1024, %s926_s3, [#allocation5], %s764_s20, %s764_s20, %s765_s21  }
 0x1e7   :  { %757 = dma.done.wait [#allocation5], 1024  }
 0x1e8   :  { %758 = vsyncadd [#allocation5], 4294966272 }
 0x1e9   :  { %430 = vsyncpa [#allocation4], 1 }
 0x1ea   :  { %431 = vsyncpa [#allocation7], 1 }
 0x1eb   :  { %432 = vsyncpa [#allocation5], 1 }

</bundles_post_ra>
